<compile_context>
chip_gen: v6e
topology: v6e:2x2x1
jax: 0.10.0
libtpu: 0.0.40
codegen_flags: <defaults>
</compile_context>

<pallas_src>
import jax
import jax.numpy as jnp
from jax.experimental import pallas as pl
from jax.experimental.pallas import tpu as pltpu


def lstm_kernel(x_ref, wih_ref, whh_ref, b_ref, h_out_ref, gx_sc):
    """x_ref: (T*B, I) time-major flattened; h_out_ref: (B, H) final hidden state."""
    TB = x_ref.shape[0]
    B, H = h_out_ref.shape
    T = TB // B

    # One batched input projection for every time step (no sequential dependence):
    #   gates_x[t*B:(t+1)*B, :] = x_t @ W_ih^T + (b_ih + b_hh)
    gx_sc[...] = (jnp.dot(x_ref[...], wih_ref[...],
                          preferred_element_type=jnp.float32)
                  + b_ref[...])

    # Per-lane constants for a single full-width activation pass over (B, 4H):
    #   i/f/o lane sections: sigmoid(x) = 0.5 * tanh(0.5 * x) + 0.5
    #   g lane section     : tanh(x)
    # Hoisted out of the loop (JAX does not CSE broadcasts).
    lane = jax.lax.broadcasted_iota(jnp.int32, (1, 4 * H), 1)
    is_g = jnp.logical_and(lane >= 2 * H, lane < 3 * H)
    pre = jnp.where(is_g, 1.0, 0.5).astype(jnp.float32)     # tanh argument scale
    post_a = pre                                            # output scale
    post_b = jnp.where(is_g, 0.0, 0.5).astype(jnp.float32)  # output offset

    def step(t, carry):
        h, c = carry
        start = pl.multiple_of(t * B, B)                    # sublane-aligned (B == 8k)
        gates = gx_sc[pl.ds(start, B), :] + jnp.dot(
            h, whh_ref[...], preferred_element_type=jnp.float32)
        acts = post_a * jnp.tanh(gates * pre) + post_b      # one 128-lane EUP pass
        i_g = acts[:, 0 * H:1 * H]
        f_g = acts[:, 1 * H:2 * H]
        g_g = acts[:, 2 * H:3 * H]
        o_g = acts[:, 3 * H:4 * H]
        c_new = f_g * c + i_g * g_g
        h_new = o_g * jnp.tanh(c_new)
        return (h_new, c_new)

    h0 = jnp.zeros((B, H), jnp.float32)                     # PyTorch default h0 = 0
    c0 = jnp.zeros((B, H), jnp.float32)                     # PyTorch default c0 = 0
    h_T, _ = jax.lax.fori_loop(0, T, step, (h0, c0), unroll=True)
    h_out_ref[...] = h_T


def _lstm_forward_impl(x, wih_t, whh_t, b, wlin_t, blin):
    """x: (B, T, I) float32 (batch_first, like PyTorch). Returns (B,) float32."""
    B, T, I = x.shape
    H = whh_t.shape[0]
    assert wih_t.shape == (I, 4 * H)
    assert whh_t.shape == (H, 4 * H)

    # Pad batch to the f32 sublane count (8); padded rows are zero and dropped below.
    B_pad = max(8, ((B + 7) // 8) * 8)
    x_p = jnp.zeros((B_pad, T, I), jnp.float32).at[:B].set(x)
    # Time-major and flattened: rows [t*B_pad, (t+1)*B_pad) are time step t.
    x_flat = jnp.transpose(x_p, (1, 0, 2)).reshape(T * B_pad, I)

    h_T = pl.pallas_call(
        lstm_kernel,
        out_shape=jax.ShapeDtypeStruct((B_pad, H), jnp.float32),
        in_specs=[
            pl.BlockSpec(memory_space=pltpu.MemorySpace.VMEM),  # x_flat (T*B, I)
            pl.BlockSpec(memory_space=pltpu.MemorySpace.VMEM),  # W_ih^T (I, 4H)
            pl.BlockSpec(memory_space=pltpu.MemorySpace.VMEM),  # W_hh^T (H, 4H)
            pl.BlockSpec(memory_space=pltpu.MemorySpace.VMEM),  # b_ih + b_hh (1, 4H)
        ],
        out_specs=pl.BlockSpec(memory_space=pltpu.MemorySpace.VMEM),
        scratch_shapes=[pltpu.VMEM((T * B_pad, 4 * H), jnp.float32)],  # gates_x
    )(x_flat, wih_t, whh_t, b)

    # Final Linear(H, 1) applied in XLA (fused into the same jit program):
    # matches `self.linear(lstm_out[:, -1])` followed by `.squeeze(1)`.
    return (h_T[:B] @ wlin_t + blin)[:, 0]


lstm_forward = jax.jit(_lstm_forward_impl)


def lstm_ref(x, wih_t, whh_t, b, wlin_t, blin):
    """Pure-JAX reference mirroring torch.nn.LSTM + Linear semantics."""
    B, T, I = x.shape
    H = whh_t.shape[0]

    def step(carry, x_t):
        h, c = carry
        gates = x_t @ wih_t + h @ whh_t + b
        i_g = jax.nn.sigmoid(gates[:, :H])
        f_g = jax.nn.sigmoid(gates[:, H:2 * H])
        g_g = jnp.tanh(gates[:, 2 * H:3 * H])
        o_g = jax.nn.sigmoid(gates[:, 3 * H:])
        c = f_g * c + i_g * g_g
        h = o_g * jnp.tanh(c)
        return (h, c), None

    h0 = jnp.zeros((B, H), jnp.float32)
    c0 = jnp.zeros((B, H), jnp.float32)
    (h_T, _), _ = jax.lax.scan(step, (h0, c0), jnp.transpose(x, (1, 0, 2)))
    return (h_T @ wlin_t + blin)[:, 0]


if __name__ == "__main__":
    B, T, I, H = 2, 8, 4, 32

    key = jax.random.PRNGKey(0)
    k_x, k_wih, k_whh, k_bih, k_bhh, k_wl, k_bl = jax.random.split(key, 7)

    scale = 1.0 / jnp.sqrt(H)
    x = jax.random.normal(k_x, (B, T, I), jnp.float32)

    # nn.LSTM parameter shapes: weight_ih (4H, I), weight_hh (4H, H), biases (4H,)
    w_ih = jax.random.uniform(k_wih, (4 * H, I), jnp.float32, -scale, scale)
    w_hh = jax.random.uniform(k_whh, (4 * H, H), jnp.float32, -scale, scale)
    b_ih = jax.random.uniform(k_bih, (4 * H,), jnp.float32, -scale, scale)
    b_hh = jax.random.uniform(k_bhh, (4 * H,), jnp.float32, -scale, scale)
    # nn.Linear(H, 1): weight (1, H), bias (1,)
    w_lin = jax.random.uniform(k_wl, (1, H), jnp.float32, -scale, scale)
    b_lin = jax.random.uniform(k_bl, (1,), jnp.float32, -scale, scale)

    # Pre-transposed / combined parameters for the kernel.
    wih_t = jnp.transpose(w_ih)                  # (I, 4H)
    whh_t = jnp.transpose(w_hh)                  # (H, 4H)
    b_comb = (b_ih + b_hh).reshape(1, 4 * H)     # (1, 4H)
    wlin_t = jnp.transpose(w_lin)                # (H, 1)
    blin = b_lin.reshape(1, 1)                   # (1, 1)

    out = lstm_forward(x, wih_t, whh_t, b_comb, wlin_t, blin)
    jax.block_until_ready(out)

    ref = lstm_ref(x, wih_t, whh_t, b_comb, wlin_t, blin)
    assert out.shape == (B,)
    assert jnp.allclose(out, ref, atol=1e-5, rtol=1e-5), (out, ref)

    print("KERNEL_OK")
</pallas_src>

<mosaic_0001>
module attributes {stable_mosaic.version = 11 : i64} {
  func.func @lstm_kernel(%arg0: memref<64x4xf32, #tpu.memory_space<vmem>>, %arg1: memref<4x128xf32, #tpu.memory_space<vmem>>, %arg2: memref<32x128xf32, #tpu.memory_space<vmem>>, %arg3: memref<1x128xf32, #tpu.memory_space<vmem>>, %arg4: memref<8x32xf32, #tpu.memory_space<vmem>>, %arg5: memref<64x128xf32, #tpu.memory_space<vmem>>) attributes {dimension_semantics = [], scalar_prefetch = 0 : i64, scratch_operands = 1 : i64, tpu.core_type = #tpu.core_type<tc>} {
    %c0 = arith.constant 0 : index
    %c0_0 = arith.constant 0 : index
    %0 = vector.load %arg0[%c0, %c0_0] : memref<64x4xf32, #tpu.memory_space<vmem>>, vector<64x4xf32>
    %c0_1 = arith.constant 0 : index
    %c0_2 = arith.constant 0 : index
    %1 = vector.load %arg1[%c0_1, %c0_2] : memref<4x128xf32, #tpu.memory_space<vmem>>, vector<4x128xf32>
    %cst = arith.constant dense<0.000000e+00> : vector<64x128xf32>
    %2 = tpu.matmul %0, %1, %cst {dimension_numbers = #tpu.dot_dimension_numbers<[1], [0], [0], [1], [0, 0, 1, 1], [], []>} : vector<64x4xf32>, vector<4x128xf32>, vector<64x128xf32> -> vector<64x128xf32>
    %c0_3 = arith.constant 0 : index
    %c0_4 = arith.constant 0 : index
    %3 = vector.load %arg3[%c0_3, %c0_4] : memref<1x128xf32, #tpu.memory_space<vmem>>, vector<1x128xf32>
    %4 = vector.broadcast %3 : vector<1x128xf32> to vector<64x128xf32>
    %5 = arith.addf %2, %4 : vector<64x128xf32>
    %c0_5 = arith.constant 0 : index
    %c0_6 = arith.constant 0 : index
    %6 = vector.load %arg5[%c0_5, %c0_6] : memref<64x128xf32, #tpu.memory_space<vmem>>, vector<64x128xf32>
    tpu.vector_store %arg5[%c0_5, %c0_6], %5 {strides = array<i32>} : memref<64x128xf32, #tpu.memory_space<vmem>>, vector<64x128xf32>,
    %7 = tpu.iota {dimensions = array<i32: 1>} : vector<1x128xi32>
    %c64_i32 = arith.constant 64 : i32
    %8 = vector.broadcast %c64_i32 : i32 to vector<1x128xi32>
    %9 = arith.cmpi sge, %7, %8 : vector<1x128xi32>
    %c96_i32 = arith.constant 96 : i32
    %10 = vector.broadcast %c96_i32 : i32 to vector<1x128xi32>
    %11 = arith.cmpi slt, %7, %10 : vector<1x128xi32>
    %12 = arith.andi %9, %11 : vector<1x128xi1>
    %cst_7 = arith.constant 1.000000e+00 : f32
    %cst_8 = arith.constant 5.000000e-01 : f32
    %13 = vector.broadcast %cst_7 : f32 to vector<1x128xf32>
    %14 = vector.broadcast %cst_8 : f32 to vector<1x128xf32>
    %15 = arith.select %12, %13, %14 : vector<1x128xi1>, vector<1x128xf32>
    %cst_9 = arith.constant 0.000000e+00 : f32
    %cst_10 = arith.constant 5.000000e-01 : f32
    %16 = vector.broadcast %cst_9 : f32 to vector<1x128xf32>
    %17 = vector.broadcast %cst_10 : f32 to vector<1x128xf32>
    %18 = arith.select %12, %16, %17 : vector<1x128xi1>, vector<1x128xf32>
    %cst_11 = arith.constant 0.000000e+00 : f32
    %19 = vector.broadcast %cst_11 : f32 to vector<8x32xf32>
    %cst_12 = arith.constant 0.000000e+00 : f32
    %20 = vector.broadcast %cst_12 : f32 to vector<8x32xf32>
    %c0_i32 = arith.constant 0 : i32
    %c8_i32 = arith.constant 8 : i32
    %21 = arith.muli %c0_i32, %c8_i32 : i32
    %22 = tpu.assume_multiple %21, 8 : i32
    %23 = arith.index_cast %22 : i32 to index
    %c0_13 = arith.constant 0 : index
    %24 = vector.load %arg5[%23, %c0_13] : memref<64x128xf32, #tpu.memory_space<vmem>>, vector<8x128xf32>
    %c0_14 = arith.constant 0 : index
    %c0_15 = arith.constant 0 : index
    %25 = vector.load %arg2[%c0_14, %c0_15] : memref<32x128xf32, #tpu.memory_space<vmem>>, vector<32x128xf32>
    %cst_16 = arith.constant dense<0.000000e+00> : vector<8x128xf32>
    %26 = tpu.matmul %19, %25, %cst_16 {dimension_numbers = #tpu.dot_dimension_numbers<[1], [0], [0], [1], [0, 0, 1, 1], [], []>} : vector<8x32xf32>, vector<32x128xf32>, vector<8x128xf32> -> vector<8x128xf32>
    %27 = arith.addf %24, %26 : vector<8x128xf32>
    %28 = vector.broadcast %15 : vector<1x128xf32> to vector<8x128xf32>
    %29 = arith.mulf %27, %28 : vector<8x128xf32>
    %30 = math.tanh %29 : vector<8x128xf32>
    %31 = vector.broadcast %15 : vector<1x128xf32> to vector<8x128xf32>
    %32 = arith.mulf %31, %30 : vector<8x128xf32>
    %33 = vector.broadcast %18 : vector<1x128xf32> to vector<8x128xf32>
    %34 = arith.addf %32, %33 : vector<8x128xf32>
    %35 = vector.extract_strided_slice %34 {offsets = [0, 0], sizes = [8, 32], strides = [1, 1]} : vector<8x128xf32> to vector<8x32xf32>
    %36 = vector.extract_strided_slice %34 {offsets = [0, 32], sizes = [8, 32], strides = [1, 1]} : vector<8x128xf32> to vector<8x32xf32>
    %37 = vector.extract_strided_slice %34 {offsets = [0, 64], sizes = [8, 32], strides = [1, 1]} : vector<8x128xf32> to vector<8x32xf32>
    %38 = vector.extract_strided_slice %34 {offsets = [0, 96], sizes = [8, 32], strides = [1, 1]} : vector<8x128xf32> to vector<8x32xf32>
    %39 = arith.mulf %36, %20 : vector<8x32xf32>
    %40 = arith.mulf %35, %37 : vector<8x32xf32>
    %41 = arith.addf %39, %40 : vector<8x32xf32>
    %42 = math.tanh %41 : vector<8x32xf32>
    %43 = arith.mulf %38, %42 : vector<8x32xf32>
    %c1_i32 = arith.constant 1 : i32
    %c8_i32_17 = arith.constant 8 : i32
    %44 = arith.muli %c1_i32, %c8_i32_17 : i32
    %45 = tpu.assume_multiple %44, 8 : i32
    %46 = arith.index_cast %45 : i32 to index
    %c0_18 = arith.constant 0 : index
    %47 = vector.load %arg5[%46, %c0_18] : memref<64x128xf32, #tpu.memory_space<vmem>>, vector<8x128xf32>
    %c0_19 = arith.constant 0 : index
    %c0_20 = arith.constant 0 : index
    %48 = vector.load %arg2[%c0_19, %c0_20] : memref<32x128xf32, #tpu.memory_space<vmem>>, vector<32x128xf32>
    %cst_21 = arith.constant dense<0.000000e+00> : vector<8x128xf32>
    %49 = tpu.matmul %43, %48, %cst_21 {dimension_numbers = #tpu.dot_dimension_numbers<[1], [0], [0], [1], [0, 0, 1, 1], [], []>} : vector<8x32xf32>, vector<32x128xf32>, vector<8x128xf32> -> vector<8x128xf32>
    %50 = arith.addf %47, %49 : vector<8x128xf32>
    %51 = vector.broadcast %15 : vector<1x128xf32> to vector<8x128xf32>
    %52 = arith.mulf %50, %51 : vector<8x128xf32>
    %53 = math.tanh %52 : vector<8x128xf32>
    %54 = vector.broadcast %15 : vector<1x128xf32> to vector<8x128xf32>
    %55 = arith.mulf %54, %53 : vector<8x128xf32>
    %56 = vector.broadcast %18 : vector<1x128xf32> to vector<8x128xf32>
    %57 = arith.addf %55, %56 : vector<8x128xf32>
    %58 = vector.extract_strided_slice %57 {offsets = [0, 0], sizes = [8, 32], strides = [1, 1]} : vector<8x128xf32> to vector<8x32xf32>
    %59 = vector.extract_strided_slice %57 {offsets = [0, 32], sizes = [8, 32], strides = [1, 1]} : vector<8x128xf32> to vector<8x32xf32>
    %60 = vector.extract_strided_slice %57 {offsets = [0, 64], sizes = [8, 32], strides = [1, 1]} : vector<8x128xf32> to vector<8x32xf32>
    %61 = vector.extract_strided_slice %57 {offsets = [0, 96], sizes = [8, 32], strides = [1, 1]} : vector<8x128xf32> to vector<8x32xf32>
    %62 = arith.mulf %59, %41 : vector<8x32xf32>
    %63 = arith.mulf %58, %60 : vector<8x32xf32>
    %64 = arith.addf %62, %63 : vector<8x32xf32>
    %65 = math.tanh %64 : vector<8x32xf32>
    %66 = arith.mulf %61, %65 : vector<8x32xf32>
    %c2_i32 = arith.constant 2 : i32
    %c8_i32_22 = arith.constant 8 : i32
    %67 = arith.muli %c2_i32, %c8_i32_22 : i32
    %68 = tpu.assume_multiple %67, 8 : i32
    %69 = arith.index_cast %68 : i32 to index
    %c0_23 = arith.constant 0 : index
    %70 = vector.load %arg5[%69, %c0_23] : memref<64x128xf32, #tpu.memory_space<vmem>>, vector<8x128xf32>
    %c0_24 = arith.constant 0 : index
    %c0_25 = arith.constant 0 : index
    %71 = vector.load %arg2[%c0_24, %c0_25] : memref<32x128xf32, #tpu.memory_space<vmem>>, vector<32x128xf32>
    %cst_26 = arith.constant dense<0.000000e+00> : vector<8x128xf32>
    %72 = tpu.matmul %66, %71, %cst_26 {dimension_numbers = #tpu.dot_dimension_numbers<[1], [0], [0], [1], [0, 0, 1, 1], [], []>} : vector<8x32xf32>, vector<32x128xf32>, vector<8x128xf32> -> vector<8x128xf32>
    %73 = arith.addf %70, %72 : vector<8x128xf32>
    %74 = vector.broadcast %15 : vector<1x128xf32> to vector<8x128xf32>
    %75 = arith.mulf %73, %74 : vector<8x128xf32>
    %76 = math.tanh %75 : vector<8x128xf32>
    %77 = vector.broadcast %15 : vector<1x128xf32> to vector<8x128xf32>
    %78 = arith.mulf %77, %76 : vector<8x128xf32>
    %79 = vector.broadcast %18 : vector<1x128xf32> to vector<8x128xf32>
    %80 = arith.addf %78, %79 : vector<8x128xf32>
    %81 = vector.extract_strided_slice %80 {offsets = [0, 0], sizes = [8, 32], strides = [1, 1]} : vector<8x128xf32> to vector<8x32xf32>
    %82 = vector.extract_strided_slice %80 {offsets = [0, 32], sizes = [8, 32], strides = [1, 1]} : vector<8x128xf32> to vector<8x32xf32>
    %83 = vector.extract_strided_slice %80 {offsets = [0, 64], sizes = [8, 32], strides = [1, 1]} : vector<8x128xf32> to vector<8x32xf32>
    %84 = vector.extract_strided_slice %80 {offsets = [0, 96], sizes = [8, 32], strides = [1, 1]} : vector<8x128xf32> to vector<8x32xf32>
    %85 = arith.mulf %82, %64 : vector<8x32xf32>
    %86 = arith.mulf %81, %83 : vector<8x32xf32>
    %87 = arith.addf %85, %86 : vector<8x32xf32>
    %88 = math.tanh %87 : vector<8x32xf32>
    %89 = arith.mulf %84, %88 : vector<8x32xf32>
    %c3_i32 = arith.constant 3 : i32
    %c8_i32_27 = arith.constant 8 : i32
    %90 = arith.muli %c3_i32, %c8_i32_27 : i32
    %91 = tpu.assume_multiple %90, 8 : i32
    %92 = arith.index_cast %91 : i32 to index
    %c0_28 = arith.constant 0 : index
    %93 = vector.load %arg5[%92, %c0_28] : memref<64x128xf32, #tpu.memory_space<vmem>>, vector<8x128xf32>
    %c0_29 = arith.constant 0 : index
    %c0_30 = arith.constant 0 : index
    %94 = vector.load %arg2[%c0_29, %c0_30] : memref<32x128xf32, #tpu.memory_space<vmem>>, vector<32x128xf32>
    %cst_31 = arith.constant dense<0.000000e+00> : vector<8x128xf32>
    %95 = tpu.matmul %89, %94, %cst_31 {dimension_numbers = #tpu.dot_dimension_numbers<[1], [0], [0], [1], [0, 0, 1, 1], [], []>} : vector<8x32xf32>, vector<32x128xf32>, vector<8x128xf32> -> vector<8x128xf32>
    %96 = arith.addf %93, %95 : vector<8x128xf32>
    %97 = vector.broadcast %15 : vector<1x128xf32> to vector<8x128xf32>
    %98 = arith.mulf %96, %97 : vector<8x128xf32>
    %99 = math.tanh %98 : vector<8x128xf32>
    %100 = vector.broadcast %15 : vector<1x128xf32> to vector<8x128xf32>
    %101 = arith.mulf %100, %99 : vector<8x128xf32>
    %102 = vector.broadcast %18 : vector<1x128xf32> to vector<8x128xf32>
    %103 = arith.addf %101, %102 : vector<8x128xf32>
    %104 = vector.extract_strided_slice %103 {offsets = [0, 0], sizes = [8, 32], strides = [1, 1]} : vector<8x128xf32> to vector<8x32xf32>
    %105 = vector.extract_strided_slice %103 {offsets = [0, 32], sizes = [8, 32], strides = [1, 1]} : vector<8x128xf32> to vector<8x32xf32>
    %106 = vector.extract_strided_slice %103 {offsets = [0, 64], sizes = [8, 32], strides = [1, 1]} : vector<8x128xf32> to vector<8x32xf32>
    %107 = vector.extract_strided_slice %103 {offsets = [0, 96], sizes = [8, 32], strides = [1, 1]} : vector<8x128xf32> to vector<8x32xf32>
    %108 = arith.mulf %105, %87 : vector<8x32xf32>
    %109 = arith.mulf %104, %106 : vector<8x32xf32>
    %110 = arith.addf %108, %109 : vector<8x32xf32>
    %111 = math.tanh %110 : vector<8x32xf32>
    %112 = arith.mulf %107, %111 : vector<8x32xf32>
    %c4_i32 = arith.constant 4 : i32
    %c8_i32_32 = arith.constant 8 : i32
    %113 = arith.muli %c4_i32, %c8_i32_32 : i32
    %114 = tpu.assume_multiple %113, 8 : i32
    %115 = arith.index_cast %114 : i32 to index
    %c0_33 = arith.constant 0 : index
    %116 = vector.load %arg5[%115, %c0_33] : memref<64x128xf32, #tpu.memory_space<vmem>>, vector<8x128xf32>
    %c0_34 = arith.constant 0 : index
    %c0_35 = arith.constant 0 : index
    %117 = vector.load %arg2[%c0_34, %c0_35] : memref<32x128xf32, #tpu.memory_space<vmem>>, vector<32x128xf32>
    %cst_36 = arith.constant dense<0.000000e+00> : vector<8x128xf32>
    %118 = tpu.matmul %112, %117, %cst_36 {dimension_numbers = #tpu.dot_dimension_numbers<[1], [0], [0], [1], [0, 0, 1, 1], [], []>} : vector<8x32xf32>, vector<32x128xf32>, vector<8x128xf32> -> vector<8x128xf32>
    %119 = arith.addf %116, %118 : vector<8x128xf32>
    %120 = vector.broadcast %15 : vector<1x128xf32> to vector<8x128xf32>
    %121 = arith.mulf %119, %120 : vector<8x128xf32>
    %122 = math.tanh %121 : vector<8x128xf32>
    %123 = vector.broadcast %15 : vector<1x128xf32> to vector<8x128xf32>
    %124 = arith.mulf %123, %122 : vector<8x128xf32>
    %125 = vector.broadcast %18 : vector<1x128xf32> to vector<8x128xf32>
    %126 = arith.addf %124, %125 : vector<8x128xf32>
    %127 = vector.extract_strided_slice %126 {offsets = [0, 0], sizes = [8, 32], strides = [1, 1]} : vector<8x128xf32> to vector<8x32xf32>
    %128 = vector.extract_strided_slice %126 {offsets = [0, 32], sizes = [8, 32], strides = [1, 1]} : vector<8x128xf32> to vector<8x32xf32>
    %129 = vector.extract_strided_slice %126 {offsets = [0, 64], sizes = [8, 32], strides = [1, 1]} : vector<8x128xf32> to vector<8x32xf32>
    %130 = vector.extract_strided_slice %126 {offsets = [0, 96], sizes = [8, 32], strides = [1, 1]} : vector<8x128xf32> to vector<8x32xf32>
    %131 = arith.mulf %128, %110 : vector<8x32xf32>
    %132 = arith.mulf %127, %129 : vector<8x32xf32>
    %133 = arith.addf %131, %132 : vector<8x32xf32>
    %134 = math.tanh %133 : vector<8x32xf32>
    %135 = arith.mulf %130, %134 : vector<8x32xf32>
    %c5_i32 = arith.constant 5 : i32
    %c8_i32_37 = arith.constant 8 : i32
    %136 = arith.muli %c5_i32, %c8_i32_37 : i32
    %137 = tpu.assume_multiple %136, 8 : i32
    %138 = arith.index_cast %137 : i32 to index
    %c0_38 = arith.constant 0 : index
    %139 = vector.load %arg5[%138, %c0_38] : memref<64x128xf32, #tpu.memory_space<vmem>>, vector<8x128xf32>
    %c0_39 = arith.constant 0 : index
    %c0_40 = arith.constant 0 : index
    %140 = vector.load %arg2[%c0_39, %c0_40] : memref<32x128xf32, #tpu.memory_space<vmem>>, vector<32x128xf32>
    %cst_41 = arith.constant dense<0.000000e+00> : vector<8x128xf32>
    %141 = tpu.matmul %135, %140, %cst_41 {dimension_numbers = #tpu.dot_dimension_numbers<[1], [0], [0], [1], [0, 0, 1, 1], [], []>} : vector<8x32xf32>, vector<32x128xf32>, vector<8x128xf32> -> vector<8x128xf32>
    %142 = arith.addf %139, %141 : vector<8x128xf32>
    %143 = vector.broadcast %15 : vector<1x128xf32> to vector<8x128xf32>
    %144 = arith.mulf %142, %143 : vector<8x128xf32>
    %145 = math.tanh %144 : vector<8x128xf32>
    %146 = vector.broadcast %15 : vector<1x128xf32> to vector<8x128xf32>
    %147 = arith.mulf %146, %145 : vector<8x128xf32>
    %148 = vector.broadcast %18 : vector<1x128xf32> to vector<8x128xf32>
    %149 = arith.addf %147, %148 : vector<8x128xf32>
    %150 = vector.extract_strided_slice %149 {offsets = [0, 0], sizes = [8, 32], strides = [1, 1]} : vector<8x128xf32> to vector<8x32xf32>
    %151 = vector.extract_strided_slice %149 {offsets = [0, 32], sizes = [8, 32], strides = [1, 1]} : vector<8x128xf32> to vector<8x32xf32>
    %152 = vector.extract_strided_slice %149 {offsets = [0, 64], sizes = [8, 32], strides = [1, 1]} : vector<8x128xf32> to vector<8x32xf32>
    %153 = vector.extract_strided_slice %149 {offsets = [0, 96], sizes = [8, 32], strides = [1, 1]} : vector<8x128xf32> to vector<8x32xf32>
    %154 = arith.mulf %151, %133 : vector<8x32xf32>
    %155 = arith.mulf %150, %152 : vector<8x32xf32>
    %156 = arith.addf %154, %155 : vector<8x32xf32>
    %157 = math.tanh %156 : vector<8x32xf32>
    %158 = arith.mulf %153, %157 : vector<8x32xf32>
    %c6_i32 = arith.constant 6 : i32
    %c8_i32_42 = arith.constant 8 : i32
    %159 = arith.muli %c6_i32, %c8_i32_42 : i32
    %160 = tpu.assume_multiple %159, 8 : i32
    %161 = arith.index_cast %160 : i32 to index
    %c0_43 = arith.constant 0 : index
    %162 = vector.load %arg5[%161, %c0_43] : memref<64x128xf32, #tpu.memory_space<vmem>>, vector<8x128xf32>
    %c0_44 = arith.constant 0 : index
    %c0_45 = arith.constant 0 : index
    %163 = vector.load %arg2[%c0_44, %c0_45] : memref<32x128xf32, #tpu.memory_space<vmem>>, vector<32x128xf32>
    %cst_46 = arith.constant dense<0.000000e+00> : vector<8x128xf32>
    %164 = tpu.matmul %158, %163, %cst_46 {dimension_numbers = #tpu.dot_dimension_numbers<[1], [0], [0], [1], [0, 0, 1, 1], [], []>} : vector<8x32xf32>, vector<32x128xf32>, vector<8x128xf32> -> vector<8x128xf32>
    %165 = arith.addf %162, %164 : vector<8x128xf32>
    %166 = vector.broadcast %15 : vector<1x128xf32> to vector<8x128xf32>
    %167 = arith.mulf %165, %166 : vector<8x128xf32>
    %168 = math.tanh %167 : vector<8x128xf32>
    %169 = vector.broadcast %15 : vector<1x128xf32> to vector<8x128xf32>
    %170 = arith.mulf %169, %168 : vector<8x128xf32>
    %171 = vector.broadcast %18 : vector<1x128xf32> to vector<8x128xf32>
    %172 = arith.addf %170, %171 : vector<8x128xf32>
    %173 = vector.extract_strided_slice %172 {offsets = [0, 0], sizes = [8, 32], strides = [1, 1]} : vector<8x128xf32> to vector<8x32xf32>
    %174 = vector.extract_strided_slice %172 {offsets = [0, 32], sizes = [8, 32], strides = [1, 1]} : vector<8x128xf32> to vector<8x32xf32>
    %175 = vector.extract_strided_slice %172 {offsets = [0, 64], sizes = [8, 32], strides = [1, 1]} : vector<8x128xf32> to vector<8x32xf32>
    %176 = vector.extract_strided_slice %172 {offsets = [0, 96], sizes = [8, 32], strides = [1, 1]} : vector<8x128xf32> to vector<8x32xf32>
    %177 = arith.mulf %174, %156 : vector<8x32xf32>
    %178 = arith.mulf %173, %175 : vector<8x32xf32>
    %179 = arith.addf %177, %178 : vector<8x32xf32>
    %180 = math.tanh %179 : vector<8x32xf32>
    %181 = arith.mulf %176, %180 : vector<8x32xf32>
    %c7_i32 = arith.constant 7 : i32
    %c8_i32_47 = arith.constant 8 : i32
    %182 = arith.muli %c7_i32, %c8_i32_47 : i32
    %183 = tpu.assume_multiple %182, 8 : i32
    %184 = arith.index_cast %183 : i32 to index
    %c0_48 = arith.constant 0 : index
    %185 = vector.load %arg5[%184, %c0_48] : memref<64x128xf32, #tpu.memory_space<vmem>>, vector<8x128xf32>
    %c0_49 = arith.constant 0 : index
    %c0_50 = arith.constant 0 : index
    %186 = vector.load %arg2[%c0_49, %c0_50] : memref<32x128xf32, #tpu.memory_space<vmem>>, vector<32x128xf32>
    %cst_51 = arith.constant dense<0.000000e+00> : vector<8x128xf32>
    %187 = tpu.matmul %181, %186, %cst_51 {dimension_numbers = #tpu.dot_dimension_numbers<[1], [0], [0], [1], [0, 0, 1, 1], [], []>} : vector<8x32xf32>, vector<32x128xf32>, vector<8x128xf32> -> vector<8x128xf32>
    %188 = arith.addf %185, %187 : vector<8x128xf32>
    %189 = vector.broadcast %15 : vector<1x128xf32> to vector<8x128xf32>
    %190 = arith.mulf %188, %189 : vector<8x128xf32>
    %191 = math.tanh %190 : vector<8x128xf32>
    %192 = vector.broadcast %15 : vector<1x128xf32> to vector<8x128xf32>
    %193 = arith.mulf %192, %191 : vector<8x128xf32>
    %194 = vector.broadcast %18 : vector<1x128xf32> to vector<8x128xf32>
    %195 = arith.addf %193, %194 : vector<8x128xf32>
    %196 = vector.extract_strided_slice %195 {offsets = [0, 0], sizes = [8, 32], strides = [1, 1]} : vector<8x128xf32> to vector<8x32xf32>
    %197 = vector.extract_strided_slice %195 {offsets = [0, 32], sizes = [8, 32], strides = [1, 1]} : vector<8x128xf32> to vector<8x32xf32>
    %198 = vector.extract_strided_slice %195 {offsets = [0, 64], sizes = [8, 32], strides = [1, 1]} : vector<8x128xf32> to vector<8x32xf32>
    %199 = vector.extract_strided_slice %195 {offsets = [0, 96], sizes = [8, 32], strides = [1, 1]} : vector<8x128xf32> to vector<8x32xf32>
    %200 = arith.mulf %197, %179 : vector<8x32xf32>
    %201 = arith.mulf %196, %198 : vector<8x32xf32>
    %202 = arith.addf %200, %201 : vector<8x32xf32>
    %203 = math.tanh %202 : vector<8x32xf32>
    %204 = arith.mulf %199, %203 : vector<8x32xf32>
    %c8_i32_52 = arith.constant 8 : i32
    %c0_53 = arith.constant 0 : index
    %c0_54 = arith.constant 0 : index
    %205 = vector.load %arg4[%c0_53, %c0_54] : memref<8x32xf32, #tpu.memory_space<vmem>>, vector<8x32xf32>
    tpu.vector_store %arg4[%c0_53, %c0_54], %204 {strides = array<i32>} : memref<8x32xf32, #tpu.memory_space<vmem>>, vector<8x32xf32>,
    return
  }
}

</mosaic_0001>

<bundles_post_ra>
// kernel: _lstm_forward_impl.1
= control target key start
LH: loop header
LB: loop body
LE: loop exit
PB: predicated region body
PF: predicated region fallthrough
CT: control target
= control target key end

     0   :  { %vm58_vm0 = vcmask 1043456   ;;  %vm33_vm1 = vcmask 31744   ;;  %v1190_v0 = vmov 0.0   ;;  %vm1191_vm2 = vmmov 0   ;;  %s1194_s29 = smov 32   ;;  %s1452_s1 = inlined_call_operand.vmem [shape: f32[4,128], index: 1, kind: input, shape index: {}]   ;;  %s1453_s2 = inlined_call_operand.vmem [shape: f32[32,128], index: 2, kind: input, shape index: {}]   ;;  %s1454_s0 = inlined_call_operand.vmem [shape: f32[64,4], index: 0, kind: input, shape index: {}]   ;;  %s1455_s3 = inlined_call_operand.vmem [shape: f32[1,128], index: 3, kind: input, shape index: {}]   ;;  %s1456_s4 = inlined_call_operand.vmem [shape: f32[8,32], index: 4, kind: output, shape index: {}]  }
   0x1   :  { %1065 = vmatprep.subr.mxu1 %v1190_v0  ;;  %v25_v1 = vld [vmem:[%s1452_s1] sm:$0xf]  ;;  %v1227_v2 = vld [vmem:[%s1453_s2 + $0x18] sm:$0xff]  ;;  %1073 = vmatprep.mubr.msk.f32.mxu1 %vm1191_vm2, %v1190_v0  ;;  %v18_v4 = vld [vmem:[%s1454_s0 + $0x8] sm:$0xff]  ;;  %v175_v8 = vlaneseq  ;;  %v1192_v14 = vmov 0.5   ;;  %vm187_vm6 = vcmask 261120  }
   0x2   :  { %v17_v3 = vld [vmem:[%s1454_s0] sm:$0xff]  ;;  %1051 = vmatprep.subr.msk.mxu0 %vm58_vm0, %v25_v1  ;;  %1066 = vmatpush3.msra.mxu1 %v1227_v2  ;;  %v1241_v5 = vld [vmem:[%s1453_s2 + $0x10] sm:$0xff]  ;;  %v1249_v6 = vld [vmem:[%s1453_s2 + $0x8] sm:$0xff] }
   0x3   :  { %1052 = vmatpush3.msk.msra.mxu0 %vm58_vm0, %v25_v1  ;;  %1053 = vmatprep.mubr.msk.f32.mxu0 %vm33_vm1, %v17_v3  ;;  %v1257_v7 = vld [vmem:[%s1453_s2] sm:$0xff]  ;;  %v176_v9 = vand.u32 127, %v175_v8  ;;  %v19_v46 = vld [vmem:[%s1454_s0 + $0x10] sm:$0xff]  ;;  %v20_v47 = vld [vmem:[%s1454_s0 + $0x18] sm:$0xff] }
   0x4   :  { %1067 = vmatprep.subr.mxu1 %v1190_v0  ;;  %1054 = vmatmul.mubr.msk.f32.vlgmr.msra.gmra.mxu0 %vm33_vm1, %v18_v4  ;;  %v1285_v11 = vld [vmem:[%s1455_s3] ss:$0 sm:$0xff]  ;;  %s1193_s3 = smov 64   ;;  %v22_v49 = vld [vmem:[%s1454_s0 + $0x28] sm:$0xff]  ;;  %v23_v50 = vld [vmem:[%s1454_s0 + $0x30] sm:$0xff] }
   0x5   :  { %1068 = vmatpush3.msra.mxu1 %v1241_v5  ;;  %1087 = vmatprep.subr.mxu0 %v1190_v0  ;;  %vm177_vm3 = vcmp.ge.s32.totalorder %v176_v9, 64  ;;  %vm178_vm4 = vcmp.lt.s32.totalorder %v176_v9, 96  ;;  %v21_v48 = vld [vmem:[%s1454_s0 + $0x20] sm:$0xff]  ;;  %v24_v51 = vld [vmem:[%s1454_s0 + $0x38] sm:$0xff] }
   0x6   :  { %1069 = vmatprep.subr.mxu1 %v1190_v0  ;;  %1088 = vmatpush3.msra.mxu0 %v1227_v2  ;;  %vm179_vm5 = vmand %vm177_vm3, %vm178_vm4 }
   0x7   :  { %1070 = vmatpush3.msra.mxu1 %v1249_v6  ;;  %1089 = vmatprep.subr.mxu0 %v1190_v0  ;;  %v1288_v15 = vsel %vm179_vm5, 1.0, %v1192_v14  ;;  %v1291_v21 = vsel %vm179_vm5, 0.0, %v1192_v14 }
   0x8   :  { %1071 = vmatprep.subr.mxu1 %v1190_v0  ;;  %1090 = vmatpush3.msra.mxu0 %v1241_v5 }
   0x9   :  { %1072 = vmatpush3.msra.mxu1 %v1257_v7  ;;  %1091 = vmatprep.subr.mxu0 %v1190_v0 }
   0xa   :  { %1074 = vmatmul.mubr.f32.vlgmr.msra.gmra.mxu1 %v1190_v0  ;;  %1076 = vmatprep.subr.mxu1 %v1190_v0 }
   0xb   :  { %1077 = vmatpush3.msra.mxu1 %v1227_v2  ;;  %1084 = vmatprep.mubr.msk.f32.mxu1 %vm1191_vm2, %v1190_v0 }
   0xc   :  { %1078 = vmatprep.subr.mxu1 %v1190_v0  ;;  %1092 = vmatpush3.msra.mxu0 %v1249_v6 }
   0xd   :  { %1079 = vmatpush3.msra.mxu1 %v1241_v5  ;;  %1093 = vmatprep.subr.mxu0 %v1190_v0 }
   0xe   :  { %1080 = vmatprep.subr.mxu1 %v1190_v0  ;;  %1094 = vmatpush3.msra.mxu0 %v1257_v7 }
   0xf   :  { %1081 = vmatpush3.msra.mxu1 %v1249_v6  ;;  %1109 = vmatprep.subr.mxu0 %v1190_v0 }
  0x10   :  { %1082 = vmatprep.subr.mxu1 %v1190_v0  ;;  %1056 = vmatprep.mubr.msk.f32.mxu0 %vm33_vm1, %v19_v46 }
  0x11   :  { %1083 = vmatpush3.msra.mxu1 %v1257_v7  ;;  %1057 = vmatmul.mubr.msk.f32.gmra.mxu0 %vm33_vm1, %v20_v47 }
  0x12   :  { %1098 = vmatprep.subr.mxu1 %v1190_v0  ;;  %1059 = vmatprep.mubr.msk.f32.mxu0 %vm33_vm1, %v21_v48 }
  0x15   :  { %1060 = vmatmul.mubr.msk.f32.gmra.mxu0 %vm33_vm1, %v22_v49 }
  0x16   :  { %1062 = vmatprep.mubr.msk.f32.mxu0 %vm33_vm1, %v23_v50 }
  0x19   :  { %1063 = vmatmul.mubr.msk.f32.gmra.mxu0 %vm33_vm1, %v24_v51 }
  0x1a   :  { %1095 = vmatprep.mubr.msk.f32.mxu0 %vm1191_vm2, %v1190_v0 }
  0xc4   :  { %v1055_v10 = vpop.f32.mrf.mxu0 }
  0xc5   :  { %v134_v33 = vadd.f32 %v1055_v10, %v1285_v11 }
  0xc6   :  { %v128_v12 = vpop.f32.mrf.mxu0 }
  0xc7   :  { %v129_v13 = vadd.f32 %v1285_v11, %v128_v12 }
  0xca   :  { %v257_v16 = vpop.f32.mrf.mxu1 }
  0xcb   :  { %v261_v17 = vadd.f32 %v257_v16, %v129_v13 }
  0xcc   :  { %v1075_v18 = vpop.f32.mrf.mxu1 }
  0xcd   :  { %v262_v19 = vmul.f32 %v261_v17, %v1288_v15 }
  0xcf   :  { %1158 = vtanh.f32 %v262_v19 }
  0xd1   :  { %v1058_v56 = vpop.f32.mrf.mxu0 }
  0xd3   :  { %v138_v57 = vpop.f32.mrf.mxu0 }
  0xd4   :  { %v139_v62 = vadd.f32 %v1285_v11, %v138_v57 }
  0xd5   :  { %v1355_v58 = vpop.f32.mrf.mxu0 }
  0xd6   :  { %v154_v57 = vadd.f32 %v1355_v58, %v1285_v11 }
  0xd7   :  { %v1357_v59 = vpop.f32.mrf.mxu0 }
  0xd9   :  { %v1359_v60 = vpop.f32.mrf.mxu0 }
  0xdb   :  { %v1361_v61 = vpop.f32.mrf.mxu0 }
  0xdc   :  { %v1159_v20 = vpop.eup %1158 }
  0xdd   :  { %v264_v22 = vmul.f32 %v1159_v20, %v1288_v15 }
  0xdf   :  { %v265_v23 = vadd.f32 %v264_v22, %v1291_v21 }
  0xe1   :  { %268 = vrot.lane.b32.xlu0 %v265_v23, %s1193_s3  ;;  %v266_v26 = vmul.f32 0.0, %v265_v23 }
 0x153   :  { %v269_v24 = vpop.permute.xlu0 %268 }
 0x154   :  { %v271_v25 = vmul.f32 %v269_v24, %v265_v23 }
 0x156   :  { %273 = vrot.lane.b32.xlu0 %v271_v25, %s1194_s29 }
 0x1c8   :  { %v274_v27 = vpop.permute.xlu0 %273 }
 0x1c9   :  { %v276_v28 = vadd.f32 %v274_v27, %v266_v26 }
 0x1cb   :  { %1160 = vtanh.f32 %v276_v28 }
 0x1d8   :  { %v1161_v29 = vpop.eup %1160 }
 0x1d9   :  { %279 = vrot.lane.b32.xlu1 %v1161_v29, %s1193_s3 }
 0x24b   :  { %v280_v30 = vpop.permute.xlu1 %279 }
 0x24c   :  { %v282_v31 = vmul.f32 %v280_v30, %v265_v23  ;;  %v144_v23 = vadd.f32 %v1058_v56, %v1285_v11 }
 0x24e   :  { %286 = vrot.lane.b32.xlu1 %v282_v31, %s1194_s29 }
 0x2c0   :  { %v287_v32 = vpop.permute.xlu1 %286 }
 0x2c1   :  { %1085 = vmatmul.mubr.msk.f32.vlgmr.msra.gmra.mxu1 %vm187_vm6, %v287_v32 }
 0x2c2   :  { %1099 = vmatpush3.msra.mxu1 %v1227_v2  ;;  %1106 = vmatprep.mubr.msk.f32.mxu1 %vm1191_vm2, %v1190_v0 }
 0x2c3   :  { %1100 = vmatprep.subr.mxu1 %v1190_v0 }
 0x2c4   :  { %1101 = vmatpush3.msra.mxu1 %v1241_v5 }
 0x2c5   :  { %1102 = vmatprep.subr.mxu1 %v1190_v0 }
 0x2c6   :  { %1103 = vmatpush3.msra.mxu1 %v1249_v6 }
 0x2c7   :  { %1104 = vmatprep.subr.mxu1 %v1190_v0 }
 0x2c8   :  { %1105 = vmatpush3.msra.mxu1 %v1257_v7 }
 0x2c9   :  { %1120 = vmatprep.subr.mxu1 %v1190_v0 }
 0x381   :  { %v356_v34 = vpop.f32.mrf.mxu1 }
 0x382   :  { %v360_v35 = vadd.f32 %v356_v34, %v134_v33 }
 0x383   :  { %v1086_v36 = vpop.f32.mrf.mxu1 }
 0x384   :  { %v361_v37 = vmul.f32 %v360_v35, %v1288_v15 }
 0x386   :  { %1162 = vtanh.f32 %v361_v37 }
 0x393   :  { %v1163_v38 = vpop.eup %1162 }
 0x394   :  { %v363_v39 = vmul.f32 %v1163_v38, %v1288_v15 }
 0x396   :  { %v364_v40 = vadd.f32 %v363_v39, %v1291_v21 }
 0x398   :  { %367 = vrot.lane.b32.xlu0 %v364_v40, %s1193_s3  ;;  %v365_v43 = vmul.f32 %v364_v40, %v276_v28 }
 0x40a   :  { %v368_v41 = vpop.permute.xlu0 %367 }
 0x40b   :  { %v370_v42 = vmul.f32 %v368_v41, %v364_v40 }
 0x40d   :  { %372 = vrot.lane.b32.xlu1 %v370_v42, %s1194_s29 }
 0x47f   :  { %v373_v44 = vpop.permute.xlu1 %372 }
 0x480   :  { %v375_v45 = vadd.f32 %v373_v44, %v365_v43 }
 0x482   :  { %1164 = vtanh.f32 %v375_v45 }
 0x48f   :  { %v1165_v52 = vpop.eup %1164 }
 0x490   :  { %378 = vrot.lane.b32.xlu0 %v1165_v52, %s1193_s3 }
 0x502   :  { %v379_v53 = vpop.permute.xlu0 %378 }
 0x503   :  { %v381_v54 = vmul.f32 %v379_v53, %v364_v40  ;;  %v149_v40 = vadd.f32 %v1285_v11, %v1357_v59 }
 0x505   :  { %385 = vrot.lane.b32.xlu1 %v381_v54, %s1194_s29 }
 0x577   :  { %v386_v55 = vpop.permute.xlu1 %385 }
 0x578   :  { %1096 = vmatmul.mubr.msk.f32.vlgmr.msra.gmra.mxu0 %vm187_vm6, %v386_v55 }
 0x579   :  { %1110 = vmatpush3.msra.mxu0 %v1227_v2  ;;  %1117 = vmatprep.mubr.msk.f32.mxu0 %vm1191_vm2, %v1190_v0 }
 0x57a   :  { %1111 = vmatprep.subr.mxu0 %v1190_v0 }
 0x57b   :  { %1112 = vmatpush3.msra.mxu0 %v1241_v5 }
 0x57c   :  { %1113 = vmatprep.subr.mxu0 %v1190_v0 }
 0x57d   :  { %1114 = vmatpush3.msra.mxu0 %v1249_v6 }
 0x57e   :  { %1115 = vmatprep.subr.mxu0 %v1190_v0 }
 0x57f   :  { %1116 = vmatpush3.msra.mxu0 %v1257_v7 }
 0x580   :  { %1131 = vmatprep.subr.mxu0 %v1190_v0 }
 0x638   :  { %v455_v63 = vpop.f32.mrf.mxu0 }
 0x639   :  { %v459_v1 = vadd.f32 %v455_v63, %v139_v62 }
 0x63a   :  { %v1097_v3 = vpop.f32.mrf.mxu0 }
 0x63b   :  { %v460_v4 = vmul.f32 %v459_v1, %v1288_v15 }
 0x63d   :  { %1166 = vtanh.f32 %v460_v4 }
 0x64a   :  { %v1167_v8 = vpop.eup %1166 }
 0x64b   :  { %v462_v9 = vmul.f32 %v1167_v8, %v1288_v15 }
 0x64d   :  { %v463_v10 = vadd.f32 %v462_v9, %v1291_v21 }
 0x64f   :  { %466 = vrot.lane.b32.xlu0 %v463_v10, %s1193_s3  ;;  %v464_v14 = vmul.f32 %v463_v10, %v375_v45 }
 0x6c1   :  { %v467_v12 = vpop.permute.xlu0 %466 }
 0x6c2   :  { %v469_v13 = vmul.f32 %v467_v12, %v463_v10 }
 0x6c4   :  { %471 = vrot.lane.b32.xlu1 %v469_v13, %s1194_s29  ;;  %v159_v13 = vadd.f32 %v1285_v11, %v1361_v61 }
 0x736   :  { %v472_v16 = vpop.permute.xlu1 %471 }
 0x737   :  { %v474_v17 = vadd.f32 %v472_v16, %v464_v14 }
 0x739   :  { %1168 = vtanh.f32 %v474_v17 }
 0x746   :  { %v1169_v18 = vpop.eup %1168 }
 0x747   :  { %477 = vrot.lane.b32.xlu0 %v1169_v18, %s1193_s3 }
 0x7b9   :  { %v478_v19 = vpop.permute.xlu0 %477 }
 0x7ba   :  { %v480_v20 = vmul.f32 %v478_v19, %v463_v10 }
 0x7bc   :  { %484 = vrot.lane.b32.xlu1 %v480_v20, %s1194_s29 }
 0x82e   :  { %v485_v22 = vpop.permute.xlu1 %484 }
 0x82f   :  { %1107 = vmatmul.mubr.msk.f32.vlgmr.msra.gmra.mxu1 %vm187_vm6, %v485_v22 }
 0x830   :  { %1121 = vmatpush3.msra.mxu1 %v1227_v2  ;;  %1128 = vmatprep.mubr.msk.f32.mxu1 %vm1191_vm2, %v1190_v0 }
 0x831   :  { %1122 = vmatprep.subr.mxu1 %v1190_v0 }
 0x832   :  { %1123 = vmatpush3.msra.mxu1 %v1241_v5 }
 0x833   :  { %1124 = vmatprep.subr.mxu1 %v1190_v0 }
 0x834   :  { %1125 = vmatpush3.msra.mxu1 %v1249_v6 }
 0x835   :  { %1126 = vmatprep.subr.mxu1 %v1190_v0 }
 0x836   :  { %1127 = vmatpush3.msra.mxu1 %v1257_v7 }
 0x837   :  { %1142 = vmatprep.subr.mxu1 %v1190_v0 }
 0x8ef   :  { %v554_v24 = vpop.f32.mrf.mxu1 }
 0x8f0   :  { %v558_v25 = vadd.f32 %v554_v24, %v144_v23 }
 0x8f1   :  { %v1108_v26 = vpop.f32.mrf.mxu1 }
 0x8f2   :  { %v559_v27 = vmul.f32 %v558_v25, %v1288_v15 }
 0x8f4   :  { %1170 = vtanh.f32 %v559_v27 }
 0x901   :  { %v1171_v28 = vpop.eup %1170 }
 0x902   :  { %v561_v29 = vmul.f32 %v1171_v28, %v1288_v15 }
 0x904   :  { %v562_v30 = vadd.f32 %v561_v29, %v1291_v21 }
 0x906   :  { %565 = vrot.lane.b32.xlu0 %v562_v30, %s1193_s3  ;;  %v563_v33 = vmul.f32 %v562_v30, %v474_v17 }
 0x978   :  { %v566_v31 = vpop.permute.xlu0 %565 }
 0x979   :  { %v568_v32 = vmul.f32 %v566_v31, %v562_v30  ;;  %v164_v31 = vadd.f32 %v1359_v60, %v1285_v11 }
 0x97b   :  { %570 = vrot.lane.b32.xlu1 %v568_v32, %s1194_s29 }
 0x9ed   :  { %v571_v34 = vpop.permute.xlu1 %570 }
 0x9ee   :  { %v573_v35 = vadd.f32 %v571_v34, %v563_v33 }
 0x9f0   :  { %1172 = vtanh.f32 %v573_v35 }
 0x9fd   :  { %v1173_v36 = vpop.eup %1172 }
 0x9fe   :  { %576 = vrot.lane.b32.xlu0 %v1173_v36, %s1193_s3 }
 0xa70   :  { %v577_v37 = vpop.permute.xlu0 %576 }
 0xa71   :  { %v579_v38 = vmul.f32 %v577_v37, %v562_v30 }
 0xa73   :  { %583 = vrot.lane.b32.xlu1 %v579_v38, %s1194_s29 }
 0xae5   :  { %v584_v39 = vpop.permute.xlu1 %583 }
 0xae6   :  { %1118 = vmatmul.mubr.msk.f32.vlgmr.msra.gmra.mxu0 %vm187_vm6, %v584_v39 }
 0xae7   :  { %1132 = vmatpush3.msra.mxu0 %v1227_v2  ;;  %1139 = vmatprep.mubr.msk.f32.mxu0 %vm1191_vm2, %v1190_v0 }
 0xae8   :  { %1133 = vmatprep.subr.mxu0 %v1190_v0 }
 0xae9   :  { %1134 = vmatpush3.msra.mxu0 %v1241_v5 }
 0xaea   :  { %1135 = vmatprep.subr.mxu0 %v1190_v0 }
 0xaeb   :  { %1136 = vmatpush3.msra.mxu0 %v1249_v6 }
 0xaec   :  { %1137 = vmatprep.subr.mxu0 %v1190_v0 }
 0xaed   :  { %1138 = vmatpush3.msra.mxu0 %v1257_v7 }
 0xba6   :  { %v653_v41 = vpop.f32.mrf.mxu0 }
 0xba7   :  { %v657_v42 = vadd.f32 %v653_v41, %v149_v40 }
 0xba8   :  { %v1119_v43 = vpop.f32.mrf.mxu0 }
 0xba9   :  { %v658_v44 = vmul.f32 %v657_v42, %v1288_v15 }
 0xbab   :  { %1174 = vtanh.f32 %v658_v44 }
 0xbb8   :  { %v1175_v45 = vpop.eup %1174 }
 0xbb9   :  { %v660_v46 = vmul.f32 %v1175_v45, %v1288_v15 }
 0xbbb   :  { %v661_v47 = vadd.f32 %v660_v46, %v1291_v21 }
 0xbbd   :  { %664 = vrot.lane.b32.xlu0 %v661_v47, %s1193_s3  ;;  %v662_v50 = vmul.f32 %v661_v47, %v573_v35 }
 0xc2f   :  { %v665_v48 = vpop.permute.xlu0 %664 }
 0xc30   :  { %v667_v49 = vmul.f32 %v665_v48, %v661_v47 }
 0xc32   :  { %669 = vrot.lane.b32.xlu1 %v667_v49, %s1194_s29 }
 0xca4   :  { %v670_v51 = vpop.permute.xlu1 %669 }
 0xca5   :  { %v672_v52 = vadd.f32 %v670_v51, %v662_v50 }
 0xca7   :  { %1176 = vtanh.f32 %v672_v52 }
 0xcb4   :  { %v1177_v53 = vpop.eup %1176 }
 0xcb5   :  { %675 = vrot.lane.b32.xlu0 %v1177_v53, %s1193_s3 }
 0xd27   :  { %v676_v54 = vpop.permute.xlu0 %675 }
 0xd28   :  { %v678_v55 = vmul.f32 %v676_v54, %v661_v47 }
 0xd2a   :  { %682 = vrot.lane.b32.xlu1 %v678_v55, %s1194_s29 }
 0xd9c   :  { %v683_v56 = vpop.permute.xlu1 %682 }
 0xd9d   :  { %1129 = vmatmul.mubr.msk.f32.vlgmr.msra.gmra.mxu1 %vm187_vm6, %v683_v56 }
 0xd9e   :  { %1143 = vmatpush3.msra.mxu1 %v1227_v2  ;;  %1150 = vmatprep.mubr.msk.f32.mxu1 %vm1191_vm2, %v1190_v0 }
 0xd9f   :  { %1144 = vmatprep.subr.mxu1 %v1190_v0 }
 0xda0   :  { %1145 = vmatpush3.msra.mxu1 %v1241_v5 }
 0xda1   :  { %1146 = vmatprep.subr.mxu1 %v1190_v0 }
 0xda2   :  { %1147 = vmatpush3.msra.mxu1 %v1249_v6 }
 0xda3   :  { %1148 = vmatprep.subr.mxu1 %v1190_v0 }
 0xda4   :  { %1149 = vmatpush3.msra.mxu1 %v1257_v7 }
 0xe5d   :  { %v752_v59 = vpop.f32.mrf.mxu1 }
 0xe5e   :  { %v756_v2 = vadd.f32 %v752_v59, %v154_v57 }
 0xe5f   :  { %v1130_v62 = vpop.f32.mrf.mxu1 }
 0xe60   :  { %v757_v63 = vmul.f32 %v756_v2, %v1288_v15 }
 0xe62   :  { %1178 = vtanh.f32 %v757_v63 }
 0xe6f   :  { %v1179_v1 = vpop.eup %1178 }
 0xe70   :  { %v759_v5 = vmul.f32 %v1179_v1, %v1288_v15 }
 0xe72   :  { %v760_v3 = vadd.f32 %v759_v5, %v1291_v21 }
 0xe74   :  { %763 = vrot.lane.b32.xlu0 %v760_v3, %s1193_s3  ;;  %v761_v7 = vmul.f32 %v760_v3, %v672_v52 }
 0xee6   :  { %v764_v6 = vpop.permute.xlu0 %763 }
 0xee7   :  { %v766_v0 = vmul.f32 %v764_v6, %v760_v3 }
 0xee9   :  { %768 = vrot.lane.b32.xlu1 %v766_v0, %s1194_s29 }
 0xf5b   :  { %v769_v4 = vpop.permute.xlu1 %768 }
 0xf5c   :  { %v771_v58 = vadd.f32 %v769_v4, %v761_v7 }
 0xf5e   :  { %1180 = vtanh.f32 %v771_v58 }
 0xf6b   :  { %v1181_v8 = vpop.eup %1180 }
 0xf6c   :  { %774 = vrot.lane.b32.xlu0 %v1181_v8, %s1193_s3 }
 0xfde   :  { %v775_v9 = vpop.permute.xlu0 %774 }
 0xfdf   :  { %v777_v10 = vmul.f32 %v775_v9, %v760_v3 }
 0xfe1   :  { %781 = vrot.lane.b32.xlu1 %v777_v10, %s1194_s29 }
0x1053   :  { %v782_v12 = vpop.permute.xlu1 %781 }
0x1054   :  { %1140 = vmatmul.mubr.msk.f32.vlgmr.msra.gmra.mxu0 %vm187_vm6, %v782_v12 }
0x1114   :  { %v851_v14 = vpop.f32.mrf.mxu0 }
0x1115   :  { %v855_v16 = vadd.f32 %v851_v14, %v159_v13 }
0x1116   :  { %v1141_v17 = vpop.f32.mrf.mxu0 }
0x1117   :  { %v856_v18 = vmul.f32 %v855_v16, %v1288_v15 }
0x1119   :  { %1182 = vtanh.f32 %v856_v18 }
0x1126   :  { %v1183_v19 = vpop.eup %1182 }
0x1127   :  { %v858_v20 = vmul.f32 %v1183_v19, %v1288_v15 }
0x1129   :  { %v859_v22 = vadd.f32 %v858_v20, %v1291_v21 }
0x112b   :  { %862 = vrot.lane.b32.xlu0 %v859_v22, %s1193_s3  ;;  %v860_v25 = vmul.f32 %v859_v22, %v771_v58 }
0x119d   :  { %v863_v23 = vpop.permute.xlu0 %862 }
0x119e   :  { %v865_v24 = vmul.f32 %v863_v23, %v859_v22 }
0x11a0   :  { %867 = vrot.lane.b32.xlu1 %v865_v24, %s1194_s29 }
0x1212   :  { %v868_v26 = vpop.permute.xlu1 %867 }
0x1213   :  { %v870_v61 = vadd.f32 %v868_v26, %v860_v25 }
0x1215   :  { %1184 = vtanh.f32 %v870_v61 }
0x1222   :  { %v1185_v27 = vpop.eup %1184 }
0x1223   :  { %873 = vrot.lane.b32.xlu0 %v1185_v27, %s1193_s3 }
0x1295   :  { %v874_v28 = vpop.permute.xlu0 %873 }
0x1296   :  { %v876_v29 = vmul.f32 %v874_v28, %v859_v22 }
0x1298   :  { %880 = vrot.lane.b32.xlu1 %v876_v29, %s1194_s29 }
0x130a   :  { %v881_v30 = vpop.permute.xlu1 %880 }
0x130b   :  { %1151 = vmatmul.mubr.msk.f32.vlgmr.msra.gmra.mxu1 %vm187_vm6, %v881_v30 }
0x13cb   :  { %v950_v32 = vpop.f32.mrf.mxu1 }
0x13cc   :  { %v954_v33 = vadd.f32 %v950_v32, %v164_v31 }
0x13cd   :  { %v1152_v34 = vpop.f32.mrf.mxu1 }
0x13ce   :  { %v955_v35 = vmul.f32 %v954_v33, %v1288_v15 }
0x13d0   :  { %1186 = vtanh.f32 %v955_v35 }
0x13dd   :  { %v1187_v36 = vpop.eup %1186 }
0x13de   :  { %v957_v37 = vmul.f32 %v1187_v36, %v1288_v15 }
0x13e0   :  { %v958_v38 = vadd.f32 %v957_v37, %v1291_v21 }
0x13e2   :  { %961 = vrot.lane.b32.xlu0 %v958_v38, %s1193_s3  ;;  %v959_v41 = vmul.f32 %v958_v38, %v870_v61 }
0x1454   :  { %v962_v39 = vpop.permute.xlu0 %961 }
0x1455   :  { %v964_v40 = vmul.f32 %v962_v39, %v958_v38 }
0x1457   :  { %966 = vrot.lane.b32.xlu1 %v964_v40, %s1194_s29 }
0x14c9   :  { %v967_v42 = vpop.permute.xlu1 %966 }
0x14ca   :  { %v969_v11 = vadd.f32 %v967_v42, %v959_v41 }
0x14cc   :  { %1188 = vtanh.f32 %v969_v11 }
0x14d9   :  { %v1189_v60 = vpop.eup %1188 }
0x14da   :  { %972 = vrot.lane.b32.xlu0 %v1189_v60, %s1193_s3 }
0x154c   :  { %v973_v43 = vpop.permute.xlu0 %972 }
0x154d   :  { %v975_v44 = vmul.f32 %v973_v43, %v958_v38 }
0x154f   :  { %977 = vrot.lane.b32.xlu1 %v975_v44, %s1194_s29 }
0x15c1   :  { %v978_v15 = vpop.permute.xlu1 %977 }
0x15c2   :  { %980 = vst.msk [vmem:[%s1456_s4] sm:$0xff] %vm187_vm6, %v978_v15 }

</bundles_post_ra>
